<compile_context>
chip_gen: v7x
topology: tpu7x:2x2x1
jax: 0.10.0
libtpu: 0.0.40
codegen_flags: <defaults>
</compile_context>

<pallas_src>
import jax
import jax.numpy as jnp
from jax.experimental import pallas as pl
from jax.experimental.pallas import tpu as pltpu


def _round_up(x: int, m: int) -> int:
    return ((x + m - 1) // m) * m


def _cdiv(a: int, b: int) -> int:
    return -(-a // b)


_BB_VMEM_BUDGET = 32 << 20  # budget used when choosing the batch-block factor


def _mn_tile_cap() -> int:
    """Generation-aware cap on the M/N output tile (512 on v5e, 1024 on v6e/v7x)."""
    try:
        kind = jax.devices()[0].device_kind.lower()
    except Exception:
        return 512
    if "v5 lite" in kind or "v5e" in kind or "v5lite" in kind:
        return 512
    return 1024


def _block_spec(shape, index_map, buffers=None):
    """BlockSpec, optionally with a deeper input pipeline (graceful fallback)."""
    if buffers is not None and buffers > 2:
        try:
            return pl.BlockSpec(shape, index_map, pipeline_mode=pl.Buffered(buffers))
        except Exception:
            pass
    return pl.BlockSpec(shape, index_map)


def _make_kernel(batched: bool, use_scratch: bool, precision):
    """Tiled matmul body with a K-resident accumulator."""
    if batched:
        def contract(a, b):
            return jnp.einsum("bmk,bkn->bmn", a, b,
                              preferred_element_type=jnp.float32,
                              precision=precision)
    else:
        def contract(a, b):
            return jnp.dot(a, b, preferred_element_type=jnp.float32,
                           precision=precision)

    if use_scratch:
        # Non-f32 output: accumulate in an f32 VMEM scratch, cast once at the end.
        def kernel(x_ref, y_ref, o_ref, acc_ref):
            k = pl.program_id(3)
            p = contract(x_ref[...], y_ref[...])

            @pl.when(k == 0)
            def _():
                acc_ref[...] = p

            @pl.when(k != 0)
            def _():
                acc_ref[...] += p

            @pl.when(k == pl.num_programs(3) - 1)
            def _():
                o_ref[...] = acc_ref[...].astype(o_ref.dtype)
    else:
        # f32 output: accumulate straight into the resident output block
        # (no zero-fill, no scratch buffer, no final tile copy).
        def kernel(x_ref, y_ref, o_ref):
            k = pl.program_id(3)
            p = contract(x_ref[...], y_ref[...])

            @pl.when(k == 0)
            def _():
                o_ref[...] = p

            @pl.when(k != 0)
            def _():
                o_ref[...] += p

    return kernel


def _pallas_mm(x, y, out_dtype):
    """x: (M, K) or (B, M, K); y: (K, N) or (B, K, N); batched dims (if any) match."""
    x_batched = x.ndim == 3
    y_batched = y.ndim == 3
    M, K = x.shape[-2:]
    N = y.shape[-1]
    B = x.shape[0] if x_batched else (y.shape[0] if y_batched else 1)

    isz = jnp.dtype(x.dtype).itemsize
    osz = jnp.dtype(out_dtype).itemsize
    sub = max(8, 32 // max(isz, 1))          # dtype-aware sublane multiple for M
    cap = _mn_tile_cap()

    tm = min(cap, _round_up(M, sub))
    tn = min(cap, _round_up(N, 128))

    # K tiling: a full-extent K block needs no 128-alignment and no padding.
    if K <= 512:
        tk, Kp = K, K
    else:
        Kp = _round_up(K, 128)
        tk = next(t for t in (512, 256, 128) if Kp % t == 0)
        if Kp != K:
            # Only K ever needs real zeros (exactness of the accumulation);
            # ragged M/N/B are handled by discarded out-of-range output writes.
            x = jnp.pad(x, [(0, 0)] * (x.ndim - 1) + [(0, Kp - K)])
            y = jnp.pad(y, [(0, 0)] * (y.ndim - 2) + [(0, Kp - K), (0, 0)])

    m_grid = _cdiv(M, tm)
    n_grid = _cdiv(N, tn)
    k_grid = Kp // tk

    use_scratch = jnp.dtype(out_dtype) != jnp.dtype(jnp.float32)

    # Batch blocking only for the tiny-M, fully-batched regime (amortizes the
    # ~0.35us/step overhead), bounded by VMEM and by the "keep >= 2 parallel
    # blocks" rule so both v7x TensorCores get work.
    bb = 1
    if x_batched and y_batched and B > 1 and tm <= 64:
        per_b = 3 * (tm * tk + tk * tn) * isz + 2 * tm * tn * osz
        if use_scratch:
            per_b += tm * tn * 4
        bb = max(1, min(B, 256 // tm, _BB_VMEM_BUDGET // max(per_b, 1)))
        if m_grid == 1 and n_grid == 1 and B >= 2:
            bb = min(bb, max(1, B // 2))
    b_grid = _cdiv(B, bb)

    grid = (b_grid, m_grid, n_grid, k_grid)

    # Deeper input pipelining only when it can actually overlap several steps.
    in_bufs = 3 if (bb > 1 and b_grid * m_grid * n_grid * k_grid >= 4) else None

    # Input specs: shared operands simply ignore the batch grid coordinate
    # (no broadcast copy, and their HBM tile is fetched once per (i,j,k)).
    if x_batched:
        if bb > 1:
            x_spec = _block_spec((bb, tm, tk), lambda b, i, j, k: (b, i, k), in_bufs)
        else:
            x_spec = pl.BlockSpec((pl.Squeezed(), tm, tk), lambda b, i, j, k: (b, i, k))
    else:
        x_spec = pl.BlockSpec((tm, tk), lambda b, i, j, k: (i, k))

    if y_batched:
        if bb > 1:
            y_spec = _block_spec((bb, tk, tn), lambda b, i, j, k: (b, k, j), in_bufs)
        else:
            y_spec = pl.BlockSpec((pl.Squeezed(), tk, tn), lambda b, i, j, k: (b, k, j))
    else:
        y_spec = pl.BlockSpec((tk, tn), lambda b, i, j, k: (k, j))

    out_batched = x_batched or y_batched
    if out_batched:
        out_shape = jax.ShapeDtypeStruct((B, M, N), out_dtype)
        if bb > 1:
            out_spec = pl.BlockSpec((bb, tm, tn), lambda b, i, j, k: (b, i, j))
        else:
            out_spec = pl.BlockSpec((pl.Squeezed(), tm, tn), lambda b, i, j, k: (b, i, j))
    else:
        out_shape = jax.ShapeDtypeStruct((M, N), out_dtype)
        out_spec = pl.BlockSpec((tm, tn), lambda b, i, j, k: (i, j))

    scratch = []
    if use_scratch:
        acc_shape = (bb, tm, tn) if bb > 1 else (tm, tn)
        scratch = [pltpu.VMEM(acc_shape, jnp.float32)]

    # Explicit numerics: full f32 MXU path for f32 inputs, native path otherwise.
    precision = jax.lax.Precision.HIGHEST if x.dtype == jnp.float32 else None
    kernel = _make_kernel(batched=bb > 1, use_scratch=use_scratch, precision=precision)

    # Scoped-VMEM limit derived from the actual working set; stays well under
    # v7x's 64 MiB physical VMEM while unlocking large tiles on v5e/v6e.
    in_depth = 3 if in_bufs == 3 else 2
    ws = in_depth * bb * (tm * tk + tk * tn) * isz + 2 * bb * tm * tn * osz
    if use_scratch:
        ws += bb * tm * tn * 4
    vmem_limit = int(min(max(ws * 3 // 2 + (2 << 20), 32 << 20), 46 << 20))

    cost = pl.CostEstimate(
        flops=2 * B * M * N * K,
        transcendentals=0,
        bytes_accessed=int(x.size * isz
                           + y.size * jnp.dtype(y.dtype).itemsize
                           + B * M * N * osz),
    )

    return pl.pallas_call(
        kernel,
        out_shape=out_shape,
        grid_spec=pltpu.PrefetchScalarGridSpec(
            num_scalar_prefetch=0,
            grid=grid,
            in_specs=[x_spec, y_spec],
            out_specs=out_spec,
            scratch_shapes=scratch,
        ),
        compiler_params=pltpu.CompilerParams(
            dimension_semantics=("parallel", "parallel", "parallel", "arbitrary"),
            vmem_limit_bytes=vmem_limit,
        ),
        cost_estimate=cost,
    )(x, y)


def pallas_matmul(x: jax.Array, y: jax.Array, *, compute_dtype=None) -> jax.Array:
    """torch.matmul equivalent for >=2-D inputs with broadcastable batch dims.

    compute_dtype: optionally cast inputs (e.g. jnp.bfloat16) to use the fast
    bf16-native MXU path on v6e/v7x; default keeps input dtype with HIGHEST
    precision for f32 (torch.matmul-faithful numerics).
    """
    assert x.ndim >= 2 and y.ndim >= 2, "wrapper expects >=2-D inputs"
    M, K = x.shape[-2], x.shape[-1]
    K2, N = y.shape[-2], y.shape[-1]
    assert K == K2, f"incompatible shapes {x.shape} @ {y.shape}"

    out_dtype = jnp.result_type(x.dtype, y.dtype)
    # TODO(synk): integer inputs accumulate in f32 on the MXU (v7x has no int MXU
    # path), so exact torch integer-matmul semantics are not reproduced.
    if compute_dtype is not None:
        x = x.astype(compute_dtype)
        y = y.astype(compute_dtype)
    elif x.dtype != y.dtype:
        x = x.astype(out_dtype)
        y = y.astype(out_dtype)

    batch_shape = jnp.broadcast_shapes(x.shape[:-2], y.shape[:-2])
    B = 1
    for d in batch_shape:
        B *= int(d)

    x_shared = all(d == 1 for d in x.shape[:-2])
    y_shared = all(d == 1 for d in y.shape[:-2])

    # Canonicalize without materializing broadcasts where possible.
    if x_shared:
        x_c = x.reshape(M, K)
    elif x.shape[:-2] == batch_shape:
        x_c = x.reshape(B, M, K)          # free reshape, no copy
    else:
        x_c = jnp.broadcast_to(x, batch_shape + (M, K)).reshape(B, M, K)
        x_shared = False
    if y_shared:
        y_c = y.reshape(K, N)
    elif y.shape[:-2] == batch_shape:
        y_c = y.reshape(B, K, N)
    else:
        y_c = jnp.broadcast_to(y, batch_shape + (K, N)).reshape(B, K, N)
        y_shared = False

    if x_shared and y_shared:
        out = _pallas_mm(x_c, y_c, out_dtype)                    # (M, N)
    elif y_shared:
        # Batched x @ shared weight: fold batch into M -> one big 2-D matmul.
        out = _pallas_mm(x_c.reshape(B * M, K), y_c, out_dtype)  # (B*M, N)
    else:
        out = _pallas_mm(x_c, y_c, out_dtype)                    # (B, M, N)

    return out.reshape(batch_shape + (M, N))


class Matmul:
    """Pallas analogue of the PyTorch Matmul module: forward(x, y) = matmul(x, y)."""

    def __call__(self, x, y):
        return pallas_matmul(x, y)


if __name__ == "__main__":
    key = jax.random.PRNGKey(0)
    k0, k1, k2, k3, k4, k5, k6, k7, k8, k9 = jax.random.split(key, 10)
    mm = Matmul()

    # 1) Small batched case consistent with the test harness's Matmul() usage:
    #    x: (batch=2, seq=8, hidden=32) @ y: (batch=2, hidden=32, out=128)
    B, M, K, N = 2, 8, 32, 128
    x = jax.random.normal(k0, (B, M, K), dtype=jnp.float32)
    y = jax.random.normal(k1, (B, K, N), dtype=jnp.float32)
    out = jax.block_until_ready(mm(x, y))
    ref = jnp.matmul(x, y)
    assert out.shape == (B, M, N), out.shape
    assert jnp.allclose(out, ref, atol=1e-2, rtol=1e-2), "mismatch (batched case)"

    # 2) Ragged 2-D case: exercises cdiv grids without any padding.
    a = jax.random.normal(k2, (136, 200), dtype=jnp.float32)
    b = jax.random.normal(k3, (200, 260), dtype=jnp.float32)
    out2 = jax.block_until_ready(mm(a, b))
    ref2 = jnp.matmul(a, b)
    assert out2.shape == (136, 260), out2.shape
    assert jnp.allclose(out2, ref2, atol=1e-2, rtol=1e-2), "mismatch (ragged 2-D case)"

    # 3) Batched x @ shared weight: exercises the fold-into-M path (no broadcast copy).
    c = jax.random.normal(k4, (2, 8, 32), dtype=jnp.float32)
    w = jax.random.normal(k5, (32, 128), dtype=jnp.float32)
    out3 = jax.block_until_ready(mm(c, w))
    ref3 = jnp.matmul(c, w)
    assert out3.shape == (2, 8, 128), out3.shape
    assert jnp.allclose(out3, ref3, atol=1e-2, rtol=1e-2), "mismatch (shared-weight case)"

    # 4) Tiny-M fully-batched case: exercises the batch-blocked einsum kernel.
    d = jax.random.normal(k6, (16, 8, 128), dtype=jnp.float32)
    e = jax.random.normal(k7, (16, 128, 256), dtype=jnp.float32)
    out4 = jax.block_until_ready(mm(d, e))
    ref4 = jnp.matmul(d, e)
    assert out4.shape == (16, 8, 256), out4.shape
    assert jnp.allclose(out4, ref4, atol=1e-2, rtol=1e-2), "mismatch (batch-blocked case)"

    # 5) bf16 inputs: exercises the scratch-accumulator (non-f32 output) path.
    f = jax.random.normal(k8, (2, 8, 32), dtype=jnp.bfloat16)
    g = jax.random.normal(k9, (2, 32, 128), dtype=jnp.bfloat16)
    out5 = jax.block_until_ready(mm(f, g))
    ref5 = jnp.matmul(f, g)
    assert out5.dtype == jnp.bfloat16 and out5.shape == (2, 8, 128)
    assert jnp.allclose(out5.astype(jnp.float32), ref5.astype(jnp.float32),
                        atol=5e-2, rtol=5e-2), "mismatch (bf16 case)"

    print("KERNEL_OK")
</pallas_src>

<mosaic_0001>
module attributes {stable_mosaic.version = 11 : i64} {
  func.func @kernel(%arg0: i32, %arg1: i32, %arg2: i32, %arg3: i32, %arg4: memref<1x8x32xf32, #tpu.memory_space<vmem>>, %arg5: memref<1x32x128xf32, #tpu.memory_space<vmem>>, %arg6: memref<1x8x128xf32, #tpu.memory_space<vmem>>) attributes {dimension_semantics = [#tpu.dimension_semantics<parallel>, #tpu.dimension_semantics<parallel>, #tpu.dimension_semantics<parallel>, #tpu.dimension_semantics<arbitrary>], iteration_bounds = array<i64: 2, 1, 1, 1>, scalar_prefetch = 0 : i64, scratch_operands = 0 : i64, tpu.core_type = #tpu.core_type<tc>, window_params = [{transform_indices = @transform_0, window_bounds = array<i64: 1, 8, 32>}, {transform_indices = @transform_1, window_bounds = array<i64: 1, 32, 128>}, {transform_indices = @transform_2, window_bounds = array<i64: 1, 8, 128>}]} {
    %c0 = arith.constant 0 : index
    %c0_0 = arith.constant 0 : index
    %c0_1 = arith.constant 0 : index
    %0 = vector.load %arg4[%c0, %c0_0, %c0_1] : memref<1x8x32xf32, #tpu.memory_space<vmem>>, vector<1x8x32xf32>
    %1 = vector.shape_cast %0 : vector<1x8x32xf32> to vector<8x32xf32>
    %c0_2 = arith.constant 0 : index
    %c0_3 = arith.constant 0 : index
    %c0_4 = arith.constant 0 : index
    %2 = vector.load %arg5[%c0_2, %c0_3, %c0_4] : memref<1x32x128xf32, #tpu.memory_space<vmem>>, vector<1x32x128xf32>
    %3 = vector.shape_cast %2 : vector<1x32x128xf32> to vector<32x128xf32>
    %cst = arith.constant dense<0.000000e+00> : vector<8x128xf32>
    %4 = tpu.matmul %1, %3, %cst {dimension_numbers = #tpu.dot_dimension_numbers<[1], [0], [0], [1], [0, 0, 1, 1], [], []>, precision = #tpu.contract_precision<fp32>} : vector<8x32xf32>, vector<32x128xf32>, vector<8x128xf32> -> vector<8x128xf32>
    %c0_i32 = arith.constant 0 : i32
    %5 = arith.cmpi eq, %arg3, %c0_i32 : i32
    %6 = arith.extui %5 : i1 to i32
    %c0_i32_5 = arith.constant 0 : i32
    %7 = arith.cmpi ne, %6, %c0_i32_5 : i32
    scf.if %7 {
      %c0_8 = arith.constant 0 : index
      %c0_9 = arith.constant 0 : index
      %c0_10 = arith.constant 0 : index
      %11 = vector.load %arg6[%c0_8, %c0_9, %c0_10] : memref<1x8x128xf32, #tpu.memory_space<vmem>>, vector<1x8x128xf32>
      %12 = vector.shape_cast %11 : vector<1x8x128xf32> to vector<8x128xf32>
      %13 = vector.shape_cast %4 : vector<8x128xf32> to vector<1x8x128xf32>
      tpu.vector_store %arg6[%c0_8, %c0_9, %c0_10], %13 {strides = array<i32>} : memref<1x8x128xf32, #tpu.memory_space<vmem>>, vector<1x8x128xf32>,
    } else {
    }
    %c0_i32_6 = arith.constant 0 : i32
    %8 = arith.cmpi ne, %arg3, %c0_i32_6 : i32
    %9 = arith.extui %8 : i1 to i32
    %c0_i32_7 = arith.constant 0 : i32
    %10 = arith.cmpi ne, %9, %c0_i32_7 : i32
    scf.if %10 {
      %c0_8 = arith.constant 0 : index
      %c0_9 = arith.constant 0 : index
      %c0_10 = arith.constant 0 : index
      %11 = vector.load %arg6[%c0_8, %c0_9, %c0_10] : memref<1x8x128xf32, #tpu.memory_space<vmem>>, vector<1x8x128xf32>
      %12 = vector.shape_cast %11 : vector<1x8x128xf32> to vector<8x128xf32>
      %13 = arith.addf %12, %4 : vector<8x128xf32>
      %c0_11 = arith.constant 0 : index
      %c0_12 = arith.constant 0 : index
      %c0_13 = arith.constant 0 : index
      %14 = vector.load %arg6[%c0_11, %c0_12, %c0_13] : memref<1x8x128xf32, #tpu.memory_space<vmem>>, vector<1x8x128xf32>
      %15 = vector.shape_cast %14 : vector<1x8x128xf32> to vector<8x128xf32>
      %16 = vector.shape_cast %13 : vector<8x128xf32> to vector<1x8x128xf32>
      tpu.vector_store %arg6[%c0_11, %c0_12, %c0_13], %16 {strides = array<i32>} : memref<1x8x128xf32, #tpu.memory_space<vmem>>, vector<1x8x128xf32>,
    } else {
    }
    return
  }
  func.func @transform_0(%arg0: i32, %arg1: i32, %arg2: i32, %arg3: i32) -> (i32, i32, i32) {
    %c0_i32 = arith.constant 0 : i32
    return %arg0, %arg1, %arg3 : i32, i32, i32
  }
  func.func @transform_1(%arg0: i32, %arg1: i32, %arg2: i32, %arg3: i32) -> (i32, i32, i32) {
    %c0_i32 = arith.constant 0 : i32
    return %arg0, %arg3, %arg2 : i32, i32, i32
  }
  func.func @transform_2(%arg0: i32, %arg1: i32, %arg2: i32, %arg3: i32) -> (i32, i32, i32) {
    %c0_i32 = arith.constant 0 : i32
    return %arg0, %arg1, %arg2 : i32, i32, i32
  }
}

</mosaic_0001>

<bundles_post_ra>
// kernel: tpu_custom_call.1
= control target key start
LH: loop header
LB: loop body
LE: loop exit
PB: predicated region body
PF: predicated region fallthrough
CT: control target
= control target key end

     0   :  { %7 = vsyncpa [#allocation3], 0  ;;  %s1533_s0 = inlined_call_operand.hbm [shape: f32[2,8,32], index: 0, kind: input, shape index: {}]   ;;  %s1534_s1 = inlined_call_operand.hbm [shape: f32[2,32,128], index: 1, kind: input, shape index: {}]   ;;  %s1535_s2 = inlined_call_operand.hbm [shape: f32[2,8,128], index: 2, kind: output, shape index: {}]  }
   0x1   :  { %9 = vsyncpa [#allocation3 + $0x1], 0 }
   0x2   :  { %10 = vsyncpa [#allocation6], 0 }
   0x3   :  { %12 = vsyncpa [#allocation6 + $0x1], 0 }
   0x4   :  { %13 = vsyncpa [#allocation4], 0 }
   0x5   :  { %15 = vsyncpa [#allocation4 + $0x1], 0  ;;  %s1282_s9 = smov 0   ;;  %s1284_s10 = smov 0  }
   0x6   :  { %s1286_s11 = smov 0   ;;  %s1288_s12 = smov 0  }
   0x7   :  { %s1290_s13 = smov 0   ;;  %s1292_s14 = smov 0  }
   0x8 LB: > { %s880_s15 = sadd.s32 4294967295, %s1257_s14   ;;  %s881_s16 = sadd.s32 4294967294, %s1257_s14   ;;  %s1257_s14 = sphi %s1292_s14, %s21_s14   ;;  %s1253_s13 = sphi %s1290_s13, %s1554_s13   ;;  %s1249_s12 = sphi %s1288_s12, %s1553_s12   ;;  %s1245_s11 = sphi %s1286_s11, %s1552_s11   ;;  %s1241_s10 = sphi %s1284_s10, %s1551_s10   ;;  %s1237_s9 = sphi %s1282_s9, %s1550_s9  }
   0x9   : > { %s47_s17 = sadd.s32 1, %s1253_s13  ;;  %s58_s18 = sadd.s32 1, %s1245_s11 }
   0xa   : > { %p49_p0 = scmp.ge.s32.totalorder %s47_s17, 2  ;;  %p65_p1 = scmp.ne.s32.totalorder %s1245_s11, %s1241_s10 }
   0xb   : > { %p66_p2 = scmp.eq.s32.totalorder %s1257_s14, 0  ;;  %p71_p3 = scmp.ne.s32.totalorder %s1241_s10, %s1237_s9 }
   0xc   : > { %s1556_s17 = smov (%p49_p0, %s47_s17), 0  ;;  %p72_p5 = scmp.eq.s32.totalorder %s880_s15, 0 }
   0xd   : > { %p1323_p4 = por %p66_p2, %p65_p1  ;;  %s51_s20 = ssub.s32 %s1253_s13, %s1556_s17 }
   0xe   : > { %p129_p6 = scmp.eq.s32.totalorder %s880_s15, 1  ;;  %p56_p7 = scmp.eq.s32.totalorder %s51_s20, 0 }
   0xf   : > { %p1329_p8 = por %p72_p5, %p71_p3  ;;  %p135_p10 = scmp.eq.s32.totalorder %s881_s16, 1 }
  0x10   : > { %p1333_p9 = por %p129_p6, %p65_p1  ;;  %p1056_p13 = scmp.lt.s32.totalorder %s1257_s14, 2 }
  0x11   : > { %s1539_s21 = scalar_select %p1329_p8, 1, 0 }
  0x12   : > { %s1540_s22 = scalar_select %p1333_p9, 1, 0 }
  0x13   : > { %s1338_s23 = scalar_select %p56_p7, %s1245_s11, %s58_s18  }
  0x14   : > { %p1340_p11 = por %p135_p10, %p71_p3  ;;  %s1347_s25 = sand.u32 1, %s1245_s11  }
  0x15   : > { %s884_s26 = sshll.u32 %s1347_s25, 3  ;;  %s885_s27 = sshll.u32 %s1253_s13, 7 }
  0x16   : > { %s1541_s24 = scalar_select %p1340_p11, 1, 0 }
  0x17   : > { %s1354_s30 = scalar_lea.hbm %s1533_s0, %s885_s27  ;;  %s159_s3 = scalar_lea.vmem [#allocation2], %s884_s26 }
  0x18   : > { %s168_s4 = sshll.u32 %s159_s3, 4  ;;  %p1360_p0 = pnand %p1056_p13, %p1323_p4  ;;  %s1356_s4 = int_to_ptr.vmem [resolvable:$true] %s168_s4 }
  0x19   : > { %s156_s6 = scalar_lea.sflag [#allocation3], %s1347_s25  ;;  %s1111_s7 = scalar_lea.hbm %s1354_s30, 128 }
  0x1a   : > { %p1112_p3 = scmp.ne.s32.totalorder %s1354_s30, %s1111_s7  ;;  %p1113_p5 = pneg %p1360_p0 }
  0x1b   : > { %s1116_s16 = scalar_lea.hbm %s1533_s0, 256  ;;  %p1117_p4 = scmp.lt.u32.totalorder %s1354_s30, %s1533_s0 }
  0x1c   : > { %p1114_p6 = pnand %p1113_p5, %p1112_p3  ;;  %p1118_p10 = scmp.lt.u32.totalorder %s1116_s16, %s1111_s7 }
  0x1d   : > { %p1120_p12 = scmp.lt.u32.totalorder %s1111_s7, %s1354_s30 }
  0x1e   : > { %p1115_p7 = pneg %p1114_p6  ;;  %p1119_p13 = por %p1118_p10, %p1117_p4 }
  0x20   : > { %p1121_p1 = por %p1120_p12, %p1119_p13 }
  0x22   : > { %p1122_p2 = pnand %p1121_p1, %p1115_p7 }
  0x24   : > { %1125 = shalt.err (!%p1122_p2)
}
  0x25   : > { %s1126_s20 = scalar_lea.vmem %s1356_s4, 128  ;;  %s1259_s26 = smov [#allocation2]  }
  0x26   : > { %p1127_p3 = scmp.ne.s32.totalorder %s1356_s4, %s1126_s20  ;;  %s1131_s27 = sshll.u32 %s1259_s26, 4  ;;  %s1132_s27 = int_to_ptr.vmem [resolvable:$false] %s1131_s27 }
  0x27   : > { %s1133_s28 = scalar_lea.vmem %s1132_s27, 256  ;;  %p1134_p9 = scmp.lt.s32.totalorder %s1356_s4, %s1132_s27 }
  0x28   : > { %p1129_p6 = pnand %p1127_p3, %p1113_p5  ;;  %p1135_p4 = scmp.lt.s32.totalorder %s1133_s28, %s1126_s20 }
  0x2a   : > { %p1130_p11 = pneg %p1129_p6  ;;  %p1136_p10 = por %p1135_p4, %p1134_p9 }
  0x2c   : > { %p1137_p12 = pnand %p1136_p10, %p1130_p11 }
  0x2e   : > { %1140 = shalt.err (!%p1137_p12)
}
  0x2f   : > { %1048 = dma.hbm_to_vmem [thread:$0]  (!%p1360_p0), %s1354_s30, 128, %s1356_s4, %s156_s6  }
  0x30   : > { %p1543_p1 = scmp.lt.s32.totalorder %s1257_s14, 3  ;;  %p1544_p2 = scmp.ge.s32.totalorder %s1257_s14, 1 }
  0x31   : > { %s886_s3 = sshll.u32 %s1347_s25, 5  ;;  %s897_s7 = sshll.u32 %s1253_s13, 9 }
  0x32   : > { %p1396_p7 = pnand %p1544_p2, %p1543_p1  ;;  %s1405_s16 = scalar_lea.hbm %s1534_s1, %s897_s7 }
  0x33   : > { %s179_s18 = scalar_lea.vmem [#allocation5], %s886_s3  ;;  %s176_s30 = scalar_lea.sflag [#allocation6], %s1347_s25 }
  0x34   : > { %s189_s19 = sshll.u32 %s179_s18, 4  ;;  %s1141_s4 = scalar_lea.hbm %s1405_s16, 512  ;;  %s1407_s19 = int_to_ptr.vmem [resolvable:$true] %s189_s19 }
  0x35   : > { %p1142_p9 = scmp.ne.s32.totalorder %s1405_s16, %s1141_s4  ;;  %s1146_s26 = scalar_lea.hbm %s1534_s1, 1024 }
  0x36   : > { %p1147_p3 = scmp.lt.u32.totalorder %s1405_s16, %s1534_s1  ;;  %p1148_p6 = scmp.lt.u32.totalorder %s1146_s26, %s1141_s4 }
  0x37   : > { %p1144_p11 = pnand %p1142_p9, %p1113_p5  ;;  %p1150_p10 = scmp.lt.u32.totalorder %s1141_s4, %s1405_s16 }
  0x38   : > { %p1149_p4 = por %p1148_p6, %p1147_p3 }
  0x39   : > { %p1145_p13 = pneg %p1144_p11 }
  0x3a   : > { %p1151_p12 = por %p1150_p10, %p1149_p4 }
  0x3c   : > { %p1152_p1 = pnand %p1151_p12, %p1145_p13 }
  0x3e   : > { %1155 = shalt.err (!%p1152_p1)
}
  0x3f   : > { %s1156_s3 = scalar_lea.vmem %s1407_s19, 512  ;;  %s1260_s7 = smov [#allocation5]  }
  0x40   : > { %p1157_p2 = scmp.ne.s32.totalorder %s1407_s19, %s1156_s3  ;;  %s1161_s8 = sshll.u32 %s1260_s7, 4  ;;  %s1162_s8 = int_to_ptr.vmem [resolvable:$false] %s1161_s8 }
  0x41   : > { %s1163_s15 = scalar_lea.vmem %s1162_s8, 1024  ;;  %p1164_p8 = scmp.lt.s32.totalorder %s1407_s19, %s1162_s8 }
  0x42   : > { %p1159_p9 = pnand %p1157_p2, %p1113_p5  ;;  %p1165_p3 = scmp.lt.s32.totalorder %s1163_s15, %s1156_s3 }
  0x44   : > { %p1160_p11 = pneg %p1159_p9  ;;  %p1166_p6 = por %p1165_p3, %p1164_p8 }
  0x46   : > { %p1167_p4 = pnand %p1166_p6, %p1160_p11 }
  0x48   : > { %1170 = shalt.err (!%p1167_p4)
}
  0x49   : > { %s1261_s18 = smov 128   ;;  %s1262_s4 = smov 8  }
  0x4a   : > { %1051 = dma.hbm_to_vmem [thread:$0]  (!%p1360_p0), %s1405_s16, 512, %s1407_s19, %s176_s30, %s1261_s18, %s1261_s18, %s1262_s4  }
  0x4b   : > { %201 = sbr.rel (%p1396_p7) target bundleno = 345 (0x159), region = 28  ;;  %s1438_s6 = sand.u32 (!%p1396_p7), 1, %s1241_s10  }
  0x4c   : > { %s890_s20 = sshll.u32 (!%p1396_p7), %s1438_s6, 3  ;;  %s204_s26 = scalar_lea.sflag (!%p1396_p7), [#allocation3], %s1438_s6 }
  0x4d   : > { %s207_s27 = scalar_lea.vmem (!%p1396_p7), [#allocation2], %s890_s20  ;;  %p1546_p8 = scmp.ne.s32.totalorder (!%p1396_p7), %s1539_s21, 0 }
  0x52   : > { %1224 = dma.done.wait (%p1546_p8), %s204_s26, 128  }
  0x53   : > { %1226 = vsyncadd (%p1546_p8), %s204_s26, 4294967168  ;;  %s891_s25 = sshll.u32 %s1438_s6, 5  ;;  %s213_s5 = scalar_lea.sflag [#allocation6], %s1438_s6 }
  0x54   : > { %s216_s29 = scalar_lea.vmem [#allocation5], %s891_s25 }
  0x55   : > { %1228 = dma.done.wait (%p1546_p8), %s213_s5, 512  }
  0x56   : > { %1230 = vsyncadd (%p1546_p8), %s213_s5, 4294966784  ;;  %v1263_v0 = vmov 0.0|0.0   ;;  %vm1264_vm0 = vmmov 0   ;;  %v1265_v1 = vmov 0.0   ;;  %vm248_vm1 = vcmask 261120   ;;  %v244_v2 = vld [vmem:[%s216_s29] sm:$0xff] }
  0x57   : > { %994 = vmatprep.subr.bf16.mxu1 %v1263_v0  ;;  %1012 = vmatprep.subr.bf16.mxu0 %v1263_v0  ;;  %v245_v3 = vld [vmem:[%s216_s29 + $0x8] sm:$0xff]  ;;  %v246_v4 = vld [vmem:[%s216_s29 + $0x10] sm:$0xff]  ;;  %v253_v5 = vand.u32 4294901760, %v244_v2  ;;  %v247_v7 = vld [vmem:[%s216_s29 + $0x18] sm:$0xff]  ;;  %s894_s21 = sshll.u32 %s1249_s12, 7  ;;  %s241_s16 = scalar_lea.vmem [#allocation7], %s890_s20 }
  0x58   : > { %936 = vmatprep.mubr.msk.f32.mxu1 %vm1264_vm0, %v1265_v1  ;;  %969 = vmatprep.mubr.msk.f32.mxu0 %vm1264_vm0, %v1265_v1  ;;  %v256_v6 = vand.u32 4294901760, %v245_v3  ;;  %v259_v8 = vand.u32 4294901760, %v246_v4  ;;  %v243_v9 = vld [vmem:[%s207_s27] sm:$0xff]  ;;  %v262_v10 = vand.u32 4294901760, %v247_v7  ;;  %s765_s19 = sshll.u32 %s241_s16, 4  ;;  %s1484_s3 = scalar_lea.hbm %s1535_s2, %s894_s21  ;;  %s1486_s19 = int_to_ptr.vmem [resolvable:$true] %s765_s19 }
  0x59   : > { %v250_v11 = vsel %vm248_vm1, %v243_v9, 0  ;;  %v333_v13 = vsub.f32 %v244_v2, %v253_v5  ;;  %s750_s7 = scalar_lea.sflag [#allocation4], %s1438_s6  ;;  %s1171_s12 = scalar_lea.vmem %s1486_s19, 128 }
  0x5a   : > { %v995_v12 = vpack.c.bf16 %v256_v6, %v253_v5  ;;  %v340_v14 = vsub.f32 %v245_v3, %v256_v6  ;;  %v347_v15 = vsub.f32 %v246_v4, %v259_v8  ;;  %v354_v16 = vsub.f32 %v247_v7, %v262_v10  ;;  %p1172_p0 = scmp.ne.s32.totalorder %s1486_s19, %s1171_s12  ;;  %p1547_p5 = scmp.ne.s32.totalorder %s1540_s22, 0 }
  0x5b   : > { %v321_v17 = vand.u32 4294901760, %v250_v11  ;;  %v998_v18 = vpack.c.bf16 %v262_v10, %v259_v8  ;;  %v334_v19 = vand.u32 4294901760, %v333_v13  ;;  %s1266_s8 = smov [#allocation7]  }
  0x5c   : > { %996 = vmatpush3.bf16.msra.mxu1 %v995_v12  ;;  %1014 = vmatpush3.bf16.msra.mxu0 %v995_v12  ;;  %v341_v20 = vand.u32 4294901760, %v340_v14  ;;  %v348_v21 = vand.u32 4294901760, %v347_v15  ;;  %v355_v23 = vand.u32 4294901760, %v354_v16  ;;  %v1007_v39 = vpack.c.bf16 %v340_v14, %v333_v13  ;;  %p1173_p7 = pnand %p1172_p0, %p1547_p5  ;;  %s1175_s15 = sshll.u32 %s1266_s8, 4  ;;  %s1176_s15 = int_to_ptr.vmem [resolvable:$false] %s1175_s15 }
  0x5d   : > { %997 = vmatprep.subr.bf16.mxu1 %v1263_v0  ;;  %1015 = vmatprep.subr.bf16.mxu0 %v1263_v0  ;;  %v322_v22 = vsub.f32 %v250_v11, %v321_v17  ;;  %v335_v24 = vsub.f32 %v333_v13, %v334_v19  ;;  %v1010_v40 = vpack.c.bf16 %v354_v16, %v347_v15  ;;  %s1177_s18 = scalar_lea.vmem %s1176_s15, 256  ;;  %p1178_p10 = scmp.lt.s32.totalorder %s1486_s19, %s1176_s15 }
  0x5e   : > { %v342_v25 = vsub.f32 %v340_v14, %v341_v20  ;;  %v349_v26 = vsub.f32 %v347_v15, %v348_v21  ;;  %v356_v28 = vsub.f32 %v354_v16, %v355_v23  ;;  %v1019_v31 = vpack.c.bf16 %v341_v20, %v334_v19  ;;  %p1174_p13 = pneg %p1173_p7  ;;  %p1179_p12 = scmp.lt.s32.totalorder %s1177_s18, %s1171_s12 }
  0x5f   : > { %v323_v27 = vand.u32 4294901760, %v322_v22  ;;  %v336_v29 = vand.u32 4294901760, %v335_v24  ;;  %v1022_v37 = vpack.c.bf16 %v355_v23, %v348_v21 }
  0x60   : > { %999 = vmatpush3.bf16.msra.mxu1 %v998_v18  ;;  %1017 = vmatpush3.bf16.msra.mxu0 %v998_v18  ;;  %v343_v30 = vand.u32 4294901760, %v342_v25  ;;  %v350_v34 = vand.u32 4294901760, %v349_v26  ;;  %v357_v35 = vand.u32 4294901760, %v356_v28  ;;  %p1180_p1 = por %p1179_p12, %p1178_p10 }
  0x61   : > { %v324_v32 = vsub.f32 %v322_v22, %v323_v27  ;;  %1000 = vmatprep.subr.bf16.mxu1 %v1263_v0  ;;  %1018 = vmatprep.subr.bf16.mxu0 %v1263_v0 }
  0x62   : > { %v1001_v33 = vpack.c.bf16 %v343_v30, %v336_v29  ;;  %v1004_v38 = vpack.c.bf16 %v357_v35, %v350_v34  ;;  %p1181_p2 = pnand %p1180_p1, %p1174_p13 }
  0x63   : > { %v325_v36 = vand.u32 4294901760, %v324_v32  ;;  %970 = vmatmul.mubr.f32.vlgmr.msra.gmra.mrb[0].mxu0 %v323_v27 }
  0x64   : > { %1020 = vmatpush3.bf16.msra.mxu0 %v1019_v31  ;;  %980 = vmatprep.mubr.msk.f32.mxu0 %vm1264_vm0, %v1265_v1 }
  0x65   : > { %937 = vmatmul.mubr.f32.vlgmr.msra.gmra.mrb[0].mxu1 %v325_v36  ;;  %1021 = vmatprep.subr.bf16.mxu0 %v1263_v0 }
  0x66   : > { %1002 = vmatpush3.bf16.msra.mxu1 %v1001_v33  ;;  %947 = vmatprep.mubr.msk.f32.mxu1 %vm1264_vm0, %v1265_v1 }
  0x67   : > { %1003 = vmatprep.subr.bf16.mxu1 %v1263_v0 }
  0x68   : > { %1023 = vmatpush3.bf16.msra.mxu0 %v1022_v37 }
  0x69   : > { %1024 = vmatprep.subr.bf16.mxu0 %v1263_v0 }
  0x6a   : > { %1005 = vmatpush3.bf16.msra.mxu1 %v1004_v38 }
  0x6b   : > { %1006 = vmatprep.subr.bf16.mxu1 %v1263_v0  ;;  %981 = vmatmul.mubr.f32.vlgmr.msra.gmra.mrb[0].mxu0 %v321_v17 }
  0x6c   : > { %1026 = vmatpush3.bf16.msra.mxu0 %v995_v12  ;;  %991 = vmatprep.mubr.msk.f32.mxu0 %vm1264_vm0, %v1265_v1 }
  0x6d   : > { %948 = vmatmul.mubr.f32.vlgmr.msra.gmra.mrb[0].mxu1 %v321_v17  ;;  %1027 = vmatprep.subr.bf16.mxu0 %v1263_v0 }
  0x6e   : > { %1008 = vmatpush3.bf16.msra.mxu1 %v1007_v39  ;;  %958 = vmatprep.mubr.msk.f32.mxu1 %vm1264_vm0, %v1265_v1 }
  0x6f   : > { %1009 = vmatprep.subr.bf16.mxu1 %v1263_v0 }
  0x70   : > { %1029 = vmatpush3.bf16.msra.mxu0 %v998_v18 }
  0x72   : > { %1011 = vmatpush3.bf16.msra.mxu1 %v1010_v40 }
  0x73   : > { %992 = vmatmul.mubr.f32.vlgmr.msra.gmra.mrb[0].mxu0 %v321_v17 }
  0x75   : > { %959 = vmatmul.mubr.f32.vlgmr.msra.gmra.mrb[0].mxu1 %v322_v22 }
 0x146   : > { %v733_v41 = vpop.f32.mrb[0].mxu0 }
 0x147   : > { %v993_v42 = vpop.f32.mrb[1].mxu0 }
 0x148   : > { %v498_v43 = vpop.f32.mrb[0].mxu1 }
 0x149   : > { %v1030_v44 = vadd.f32 %v733_v41, %v498_v43  ;;  %v960_v45 = vpop.f32.mrb[1].mxu1 }
 0x14b   : > { %741 = vst [vmem:[%s241_s16] sm:$0xff] %v1030_v44 }
 0x14c   : > { %1184 = shalt.err (!%p1181_p2)
}
 0x14d   : > { %s1185_s4 = scalar_lea.hbm %s1484_s3, 128  ;;  %s1189_s26 = scalar_lea.hbm %s1535_s2, 256 }
 0x14e   : > { %p1186_p9 = scmp.ne.s32.totalorder %s1484_s3, %s1185_s4  ;;  %p1190_p6 = scmp.lt.u32.totalorder %s1484_s3, %s1535_s2 }
 0x14f   : > { %p1191_p4 = scmp.lt.u32.totalorder %s1189_s26, %s1185_s4  ;;  %p1193_p0 = scmp.lt.u32.totalorder %s1185_s4, %s1484_s3 }
 0x150   : > { %p1187_p11 = pnand %p1186_p9, %p1547_p5 }
 0x151   : > { %p1192_p8 = por %p1191_p4, %p1190_p6 }
 0x152   : > { %p1188_p3 = pneg %p1187_p11 }
 0x153   : > { %p1194_p7 = por %p1193_p0, %p1192_p8 }
 0x155   : > { %p1195_p13 = pnand %p1194_p7, %p1188_p3 }
 0x157   : > { %1198 = shalt.err (!%p1195_p13)
}
 0x158   : > { %1043 = dma.vmem_to_hbm [thread:$0]  (%p1547_p5), %s1486_s19, 128, %s1484_s3, %s750_s7  }
 0x159 PF: > { %s777_s5 = sand.u32 1, %s1237_s9   ;;  %p1548_p10 = scmp.ne.s32.totalorder %s1541_s24, 0 }
 0x15a   : > { %p1549_p12 = scmp.ge.s32.totalorder %s1257_s14, 2  ;;  %s778_s29 = scalar_lea.sflag [#allocation4], %s777_s5 }
 0x15c   : > { %p1053_p1 = pnand %p1549_p12, %p1548_p10 }
 0x15e   : > { %1232 = dma.done.wait (!%p1053_p1), %s778_s29, 128  }
 0x15f   : > { %1234 = vsyncadd (!%p1053_p1), %s778_s29, 4294967168  ;;  %s21_s14 = sadd.s32 1, %s1257_s14   ;;  %s1550_s9 = smov %s1241_s10 }
 0x160   : > { %p18_p2 = scmp.ge.s32.totalorder %s21_s14, 4   ;;  %s1551_s10 = smov %s1245_s11 }
 0x161   : > { %s1552_s11 = smov %s1338_s23  ;;  %s1553_s12 = smov %s1253_s13 }
 0x162   : > { %s1554_s13 = smov %s1556_s17  ;;  %20 = sbr.rel (!%p18_p2) target bundleno = 8 (0x8), region = 94 }
 0x169   :  { %783 = vsyncpa [#allocation3], 1 }
 0x16a   :  { %785 = vsyncpa [#allocation3 + $0x1], 1 }
 0x16b   :  { %786 = vsyncpa [#allocation6], 1 }
 0x16c   :  { %788 = vsyncpa [#allocation6 + $0x1], 1 }
 0x16d   :  { %789 = vsyncpa [#allocation4], 1 }
 0x16e   :  { %791 = vsyncpa [#allocation4 + $0x1], 1 }

</bundles_post_ra>
